<compile_context>
chip_gen: v7x
topology: tpu7x:2x2x1
jax: 0.10.0
libtpu: 0.0.40
codegen_flags: <defaults>
</compile_context>

<pallas_src>
import functools

import jax
import jax.numpy as jnp
import numpy as np
from jax.experimental import pallas as pl
from jax.experimental.pallas import tpu as pltpu


# ----------------------------------------------------------------------------
# Kernel: scale each input slab by its normalized weight and write it into its
# slot of the (1, num_in, r_tile, Wl) output block as one dense store.
# ----------------------------------------------------------------------------
def _cat_kernel(w_ref, *refs, num_in, epsilon):
    in_refs = refs[:num_in]
    out_ref = refs[num_in]

    # ReLU + normalization of the (2- or 3-element) weight vector, from SMEM.
    wt = [jnp.maximum(w_ref[i], jnp.float32(0.0)) for i in range(num_in)]
    inv_total = 1.0 / (sum(wt) + jnp.float32(epsilon))

    for i in range(num_in):
        scale = wt[i] * inv_total
        # Dense (1, r_tile, Wl) slab store — trailing dims are (8,128)-aligned.
        out_ref[:, i] = (in_refs[i][...] * scale).astype(out_ref.dtype)


# ----------------------------------------------------------------------------
# Tile selection helpers.
# ----------------------------------------------------------------------------
def _row_tile(R, min_rows, max_rows):
    """Largest multiple of `min_rows` dividing R, capped at `max_rows`.

    Falls back to R (full extent, still legal for BlockSpec) when R is not a
    multiple of the sublane packing.
    """
    if R % min_rows != 0:
        return R
    best = min_rows
    t = min_rows
    limit = min(R, max(min_rows, max_rows))
    while t <= limit:
        if R % t == 0:
            best = t
        t += min_rows
    return best


# ----------------------------------------------------------------------------
# Wrapper: zero-copy reshape glue around a single pallas_call.
# ----------------------------------------------------------------------------
def weighted_cat(inputs, w, dimension=1, epsilon=1e-4):
    num_in = len(inputs)
    assert num_in in (2, 3)
    shape = inputs[0].shape
    for x in inputs:
        assert x.shape == shape, "Cat expects identically shaped inputs"
    d = dimension if dimension >= 0 else dimension + len(shape)
    dtype = inputs[0].dtype
    itemsize = inputs[0].dtype.itemsize

    # Normalize weights in f32 regardless of incoming dtype (matches PyTorch).
    w = jnp.asarray(w, jnp.float32)

    # concat along dim d  ==  (Bp, num_in, N) arrangement for row-major tensors
    Bp = int(np.prod(shape[:d], dtype=np.int64)) if d > 0 else 1
    N = int(np.prod(shape[d:], dtype=np.int64))

    # Factor N = R * Wl so the trailing block dims are (rows, lanes)-dense.
    if N % 128 == 0:
        Wl = 128
        R = N // 128
    else:
        # TODO(synk): pad or masked-tile awkward N instead of one wide row.
        Wl = N
        R = 1

    # Sublane packing: f32 -> 8 rows/vreg, bf16/f16 -> 16, int8/fp8 -> 32.
    min_rows = {4: 8, 2: 16, 1: 32}.get(itemsize, 8)
    # ~1 MiB per input block; double-buffered total ~= 4*num_in*block <= ~12 MiB.
    target_in_block_bytes = 1 << 20
    max_rows = max(min_rows, target_in_block_bytes // max(1, Wl * itemsize))
    r_tile = _row_tile(R, min_rows, max_rows)

    grid = (Bp, R // r_tile)

    flat = [x.reshape(Bp, R, Wl) for x in inputs]          # zero-copy reshapes

    out_flat = pl.pallas_call(
        functools.partial(_cat_kernel, num_in=num_in, epsilon=float(epsilon)),
        out_shape=jax.ShapeDtypeStruct((Bp, num_in, R, Wl), dtype),
        grid_spec=pltpu.PrefetchScalarGridSpec(
            num_scalar_prefetch=0,
            grid=grid,
            in_specs=(
                [pl.BlockSpec(memory_space=pltpu.MemorySpace.SMEM)]   # w (scalars)
                + [pl.BlockSpec((1, r_tile, Wl), lambda b, r: (b, r, 0))
                   for _ in range(num_in)]
            ),
            out_specs=pl.BlockSpec((1, num_in, r_tile, Wl),
                                   lambda b, r: (b, 0, r, 0)),
        ),
        compiler_params=pltpu.CompilerParams(
            # Independent output blocks per (b, r) -> both axes shard on v7x.
            dimension_semantics=("parallel", "parallel"),
            vmem_limit_bytes=32 * 1024 * 1024),
    )(w, *flat)

    out_shape = shape[:d] + (num_in * shape[d],) + shape[d + 1:]
    return out_flat.reshape(out_shape)                     # zero-copy reshape


# ----------------------------------------------------------------------------
# Pure-JAX reference for a correctness cross-check.
# ----------------------------------------------------------------------------
def weighted_cat_ref(inputs, w, dimension=1, epsilon=1e-4):
    wt = jnp.maximum(jnp.asarray(w, jnp.float32), 0.0)
    wt1 = wt / (jnp.sum(wt) + epsilon)
    return jnp.concatenate([wt1[i] * x for i, x in enumerate(inputs)],
                           axis=dimension)


if __name__ == "__main__":
    B, C, H, W = 2, 4, 16, 16
    key = jax.random.PRNGKey(0)
    k1, k2, k3 = jax.random.split(key, 3)
    low = jax.random.normal(k1, (B, C, H, W), jnp.float32)
    mid = jax.random.normal(k2, (B, C, H, W), jnp.float32)
    high = jax.random.normal(k3, (B, C, H, W), jnp.float32)

    # num_in == 2 (module default init is ones; use non-trivial values, one
    # negative to exercise the ReLU clamp).
    w2 = jnp.array([1.3, 0.7], jnp.float32)
    out2 = jax.block_until_ready(weighted_cat([low, high], w2, dimension=1))
    ref2 = weighted_cat_ref([low, high], w2, dimension=1)
    np.testing.assert_allclose(np.asarray(out2), np.asarray(ref2),
                               rtol=1e-6, atol=1e-6)
    assert out2.shape == (B, 2 * C, H, W)

    # num_in == 3
    w3 = jnp.array([0.9, -0.2, 1.4], jnp.float32)
    out3 = jax.block_until_ready(weighted_cat([low, mid, high], w3, dimension=1))
    ref3 = weighted_cat_ref([low, mid, high], w3, dimension=1)
    np.testing.assert_allclose(np.asarray(out3), np.asarray(ref3),
                               rtol=1e-6, atol=1e-6)
    assert out3.shape == (B, 3 * C, H, W)

    # Awkward trailing size (N not a multiple of 128) -> fallback layout path.
    k4, k5 = jax.random.split(k3)
    a = jax.random.normal(k4, (2, 3, 5, 7), jnp.float32)
    b = jax.random.normal(k5, (2, 3, 5, 7), jnp.float32)
    w2b = jnp.array([0.4, 1.1], jnp.float32)
    outo = jax.block_until_ready(weighted_cat([a, b], w2b, dimension=1))
    refo = weighted_cat_ref([a, b], w2b, dimension=1)
    np.testing.assert_allclose(np.asarray(outo), np.asarray(refo),
                               rtol=1e-6, atol=1e-6)
    assert outo.shape == (2, 6, 5, 7)

    print("KERNEL_OK")
</pallas_src>

<mosaic_0001>
module attributes {stable_mosaic.version = 11 : i64} {
  func.func @_cat_kernel(%arg0: i32, %arg1: i32, %arg2: memref<2xf32, #tpu.memory_space<smem>>, %arg3: memref<1x8x128xf32, #tpu.memory_space<vmem>>, %arg4: memref<1x8x128xf32, #tpu.memory_space<vmem>>, %arg5: memref<1x2x8x128xf32, #tpu.memory_space<vmem>>) attributes {dimension_semantics = [#tpu.dimension_semantics<parallel>, #tpu.dimension_semantics<parallel>], iteration_bounds = array<i64: 2, 1>, scalar_prefetch = 0 : i64, scratch_operands = 0 : i64, tpu.core_type = #tpu.core_type<tc>, window_params = [{transform_indices = @transform_0, window_bounds = array<i64: 2>}, {transform_indices = @transform_1, window_bounds = array<i64: 1, 8, 128>}, {transform_indices = @transform_2, window_bounds = array<i64: 1, 8, 128>}, {transform_indices = @transform_3, window_bounds = array<i64: 1, 2, 8, 128>}]} {
    %c0 = arith.constant 0 : index
    %0 = memref.load %arg2[%c0] : memref<2xf32, #tpu.memory_space<smem>>
    %cst = arith.constant 0.000000e+00 : f32
    %1 = arith.maximumf %0, %cst : f32
    %c1 = arith.constant 1 : index
    %2 = memref.load %arg2[%c1] : memref<2xf32, #tpu.memory_space<smem>>
    %cst_0 = arith.constant 0.000000e+00 : f32
    %3 = arith.maximumf %2, %cst_0 : f32
    %cst_1 = arith.constant 0.000000e+00 : f32
    %4 = arith.addf %cst_1, %1 : f32
    %5 = arith.addf %4, %3 : f32
    %cst_2 = arith.constant 9.99999974E-5 : f32
    %6 = arith.addf %5, %cst_2 : f32
    %cst_3 = arith.constant 1.000000e+00 : f32
    %7 = arith.divf %cst_3, %6 : f32
    %8 = arith.mulf %1, %7 : f32
    %c0_4 = arith.constant 0 : index
    %c0_5 = arith.constant 0 : index
    %c0_6 = arith.constant 0 : index
    %9 = vector.load %arg3[%c0_4, %c0_5, %c0_6] : memref<1x8x128xf32, #tpu.memory_space<vmem>>, vector<1x8x128xf32>
    %10 = vector.broadcast %8 : f32 to vector<1x8x128xf32>
    %11 = arith.mulf %9, %10 : vector<1x8x128xf32>
    %c0_7 = arith.constant 0 : index
    %c0_8 = arith.constant 0 : index
    %c0_9 = arith.constant 0 : index
    %c0_10 = arith.constant 0 : index
    %12 = vector.load %arg5[%c0_7, %c0_8, %c0_9, %c0_10] : memref<1x2x8x128xf32, #tpu.memory_space<vmem>>, vector<1x1x8x128xf32>
    %13 = vector.shape_cast %12 : vector<1x1x8x128xf32> to vector<1x8x128xf32>
    %14 = vector.shape_cast %11 : vector<1x8x128xf32> to vector<1x1x8x128xf32>
    tpu.vector_store %arg5[%c0_7, %c0_8, %c0_9, %c0_10], %14 {strides = array<i32>} : memref<1x2x8x128xf32, #tpu.memory_space<vmem>>, vector<1x1x8x128xf32>,
    %15 = arith.mulf %3, %7 : f32
    %c0_11 = arith.constant 0 : index
    %c0_12 = arith.constant 0 : index
    %c0_13 = arith.constant 0 : index
    %16 = vector.load %arg4[%c0_11, %c0_12, %c0_13] : memref<1x8x128xf32, #tpu.memory_space<vmem>>, vector<1x8x128xf32>
    %17 = vector.broadcast %15 : f32 to vector<1x8x128xf32>
    %18 = arith.mulf %16, %17 : vector<1x8x128xf32>
    %c0_14 = arith.constant 0 : index
    %c1_15 = arith.constant 1 : index
    %c0_16 = arith.constant 0 : index
    %c0_17 = arith.constant 0 : index
    %19 = vector.load %arg5[%c0_14, %c1_15, %c0_16, %c0_17] : memref<1x2x8x128xf32, #tpu.memory_space<vmem>>, vector<1x1x8x128xf32>
    %20 = vector.shape_cast %19 : vector<1x1x8x128xf32> to vector<1x8x128xf32>
    %21 = vector.shape_cast %18 : vector<1x8x128xf32> to vector<1x1x8x128xf32>
    tpu.vector_store %arg5[%c0_14, %c1_15, %c0_16, %c0_17], %21 {strides = array<i32>} : memref<1x2x8x128xf32, #tpu.memory_space<vmem>>, vector<1x1x8x128xf32>,
    return
  }
  func.func @transform_0(%arg0: i32, %arg1: i32) -> i32 {
    %c0_i32 = arith.constant 0 : i32
    %c0_i32_0 = arith.constant 0 : i32
    return %c0_i32 : i32
  }
  func.func @transform_1(%arg0: i32, %arg1: i32) -> (i32, i32, i32) {
    %c0_i32 = arith.constant 0 : i32
    %c0_i32_0 = arith.constant 0 : i32
    return %arg0, %arg1, %c0_i32 : i32, i32, i32
  }
  func.func @transform_2(%arg0: i32, %arg1: i32) -> (i32, i32, i32) {
    %c0_i32 = arith.constant 0 : i32
    %c0_i32_0 = arith.constant 0 : i32
    return %arg0, %arg1, %c0_i32 : i32, i32, i32
  }
  func.func @transform_3(%arg0: i32, %arg1: i32) -> (i32, i32, i32, i32) {
    %c0_i32 = arith.constant 0 : i32
    %c0_i32_0 = arith.constant 0 : i32
    %c0_i32_1 = arith.constant 0 : i32
    return %arg0, %c0_i32, %arg1, %c0_i32_0 : i32, i32, i32, i32
  }
}

</mosaic_0001>

<bundles_post_ra>
// kernel: tpu_custom_call.1
= control target key start
LH: loop header
LB: loop body
LE: loop exit
PB: predicated region body
PF: predicated region fallthrough
CT: control target
= control target key end

     0   :  { %s973_s0 = inlined_call_operand.hbm [shape: f32[2], index: 0, kind: input, shape index: {}]   ;;  %s974_s1 = inlined_call_operand.hbm [shape: f32[2,8,128], index: 1, kind: input, shape index: {}]   ;;  %s975_s2 = inlined_call_operand.hbm [shape: f32[2,8,128], index: 2, kind: input, shape index: {}]   ;;  %s976_s3 = inlined_call_operand.hbm [shape: f32[2,2,8,128], index: 3, kind: output, shape index: {}]  }
   0x1   :  { %983 = sst [smem:[#allocation14_spill]] %s973_s0 }
   0x2   :  { %984 = sst [smem:[#allocation15_spill]] %s974_s1 }
   0x3   :  { %8 = vsyncpa [#allocation5], 0 }
   0x4   :  { %9 = vsyncpa [#allocation3], 0 }
   0x5   :  { %11 = vsyncpa [#allocation3 + $0x1], 0 }
   0x6   :  { %12 = vsyncpa [#allocation8], 0 }
   0x7   :  { %14 = vsyncpa [#allocation8 + $0x1], 0 }
   0x8   :  { %15 = vsyncpa [#allocation4], 0 }
   0x9   :  { %17 = vsyncpa [#allocation4 + $0x1], 0  ;;  %s710_s12 = smov 0   ;;  %s712_s13 = smov 0  }
   0xa   :  { %s714_s14 = smov 0   ;;  %s716_s15 = smov 0  }
   0xb   :  { %s718_s16 = smov 0   ;;  %s720_s17 = smov 0  }
   0xc LB: > { %s411_s18 = sadd.s32 4294967295, %s681_s17   ;;  %s412_s19 = sadd.s32 4294967294, %s681_s17   ;;  %s681_s17 = sphi %s720_s17, %s23_s17   ;;  %s677_s16 = sphi %s718_s16, %s1007_s16   ;;  %s673_s15 = sphi %s716_s15, %s1006_s15   ;;  %s669_s14 = sphi %s714_s14, %s1005_s14   ;;  %s665_s13 = sphi %s712_s13, %s1004_s13   ;;  %s661_s12 = sphi %s710_s12, %s1003_s12  }
   0xd   : > { %p72_p0 = scmp.ne.s32.totalorder %s669_s14, %s665_s13  ;;  %p78_p1 = scmp.ne.s32.totalorder %s665_s13, %s661_s12 }
   0xe   : > { %p746_p2 = scmp.eq.s32.totalorder %s411_s18, 0  ;;  %p132_p3 = scmp.eq.s32.totalorder %s411_s18, 1 }
   0xf   : > { %p138_p4 = scmp.eq.s32.totalorder %s412_s19, 1  ;;  %p413_p5 = scmp.ge.s32.totalorder %s681_s17, 1 }
  0x10   : > { %s985_s20 = scalar_select %p746_p2, 1, 0 }
  0x11   : > { %p753_p6 = por %p746_p2, %p78_p1  ;;  %p760_p7 = por %p132_p3, %p72_p0 }
  0x12   : > { %p764_p8 = por %p138_p4, %p78_p1  ;;  %p145_p9 = scmp.lt.s32.totalorder %s681_s17, 3 }
  0x13   : > { %s986_s21 = scalar_select %p753_p6, 1, 0 }
  0x14   : > { %s987_s22 = scalar_select %p760_p7, 1, 0 }
  0x15   : > { %s988_s23 = scalar_select %p764_p8, 1, 0 }
  0x16   : > { %p769_p10 = pnand %p413_p5, %p145_p9  ;;  %s65_s25 = sadd.s32 1, %s669_s14 }
  0x17   : > { %s35_s26 = sadd.s32 1, %s677_s16  ;;  %p73_p13 = scmp.eq.s32.totalorder %s681_s17, 0 }
  0x18   : > { %s989_s24 = scalar_select %p769_p10, 1, 0 }
  0x19   : > { %p445_p12 = pneg %p769_p10  ;;  %p785_p1 = scmp.ge.s32.totalorder %s35_s26, 2 }
  0x1a   : > { %p792_p4 = por %p73_p13, %p72_p0  ;;  %p461_p5 = scmp.lt.s32.totalorder %s681_s17, 2 }
  0x1b   : > { %p781_p3 = pnand %p445_p12, %p746_p2  ;;  %s798_s30 = sand.u32 1, %s669_s14  }
  0x1c   : > { %s993_s0 = sld [smem:[#allocation14_spill]] }
  0x1d   : > { %p520_p12 = pneg %p781_p3 }
  0x22   : > { %s518_s6 = scalar_lea.hbm %s993_s0, 16 }
  0x23   : > { %p519_p9 = scmp.ne.s32.totalorder %s993_s0, %s518_s6  ;;  %p525_p0 = scmp.lt.u32.totalorder %s518_s6, %s993_s0 }
  0x25   : > { %p521_p11 = pnand %p520_p12, %p519_p9 }
  0x27   : > { %p522_p8 = pneg %p521_p11 }
  0x29   : > { %p527_p13 = pnand %p525_p0, %p522_p8 }
  0x2b   : > { %530 = shalt.err (!%p527_p13)
}
  0x2c   : > { %s683_s11 = smov [#allocation2]   ;;  %s1009_s26 = smov (%p785_p1, %s35_s26), 0 }
  0x2d   : > { %448 = dma.hbm_to_smem (!%p781_p3), %s993_s0, 16, %s683_s11, [#allocation5]  }
  0x2e   : > { %s977_s4 = sshll.u32 %s798_s30, 3  ;;  %s60_s5 = ssub.s32 %s677_s16, %s1009_s26 }
  0x2f   : > { %p63_p8 = scmp.eq.s32.totalorder %s60_s5, 0  ;;  %s417_s27 = sshll.u32 %s677_s16, 7 }
  0x30   : > { %s994_s1 = sld [smem:[#allocation15_spill]]  ;;  %s171_s9 = scalar_lea.vmem [#allocation6], %s977_s4 }
  0x31   : > { %s179_s10 = sshll.u32 %s171_s9, 4  ;;  %p840_p11 = pnand %p461_p5, %p792_p4  ;;  %s834_s10 = int_to_ptr.vmem [resolvable:$true] %s179_s10 }
  0x32   : > { %s832_s28 = scalar_select %p63_p8, %s669_s14, %s65_s25  }
  0x33   : > { %s847_s5 = scalar_lea.hbm %s975_s2, %s417_s27  ;;  %s168_s6 = scalar_lea.sflag [#allocation3], %s798_s30 }
  0x34   : > { %p533_p1 = pneg %p840_p11 }
  0x36   : > { %s827_s8 = scalar_lea.hbm %s994_s1, %s417_s27  ;;  %s536_s9 = scalar_lea.hbm %s994_s1, 256 }
  0x37   : > { %s531_s7 = scalar_lea.hbm %s827_s8, 128  ;;  %p537_p4 = scmp.lt.u32.totalorder %s827_s8, %s994_s1 }
  0x38   : > { %p532_p3 = scmp.ne.s32.totalorder %s827_s8, %s531_s7  ;;  %p538_p5 = scmp.lt.u32.totalorder %s536_s9, %s531_s7 }
  0x39   : > { %p540_p13 = scmp.lt.u32.totalorder %s531_s7, %s827_s8 }
  0x3a   : > { %p534_p9 = pnand %p533_p1, %p532_p3  ;;  %p539_p0 = por %p538_p5, %p537_p4 }
  0x3c   : > { %p535_p12 = pneg %p534_p9  ;;  %p541_p8 = por %p540_p13, %p539_p0 }
  0x3e   : > { %p542_p7 = pnand %p541_p8, %p535_p12 }
  0x40   : > { %545 = shalt.err (!%p542_p7)
}
  0x41   : > { %s546_s27 = scalar_lea.vmem %s834_s10, 128  ;;  %s684_s18 = smov [#allocation6]  }
  0x42   : > { %p547_p3 = scmp.ne.s32.totalorder %s834_s10, %s546_s27  ;;  %s551_s19 = sshll.u32 %s684_s18, 4  ;;  %s552_s19 = int_to_ptr.vmem [resolvable:$false] %s551_s19 }
  0x43   : > { %s553_s0 = scalar_lea.vmem %s552_s19, 256  ;;  %p554_p2 = scmp.lt.s32.totalorder %s834_s10, %s552_s19 }
  0x44   : > { %p549_p9 = pnand %p547_p3, %p533_p1  ;;  %p555_p4 = scmp.lt.s32.totalorder %s553_s0, %s546_s27 }
  0x46   : > { %p550_p6 = pneg %p549_p9  ;;  %p556_p5 = por %p555_p4, %p554_p2 }
  0x48   : > { %p557_p0 = pnand %p556_p5, %p550_p6 }
  0x4a   : > { %560 = shalt.err (!%p557_p0)
}
  0x4b   : > { %452 = dma.hbm_to_vmem [thread:$0]  (!%p840_p11), %s827_s8, 128, %s834_s10, %s168_s6  }
  0x4c   : > { %s996_s4 = sshll.u32 %s798_s30, 3  ;;  %s187_s29 = scalar_lea.sflag [#allocation8], %s798_s30 }
  0x4d   : > { %s190_s7 = scalar_lea.vmem [#allocation7], %s996_s4  ;;  %s561_s9 = scalar_lea.hbm %s847_s5, 128 }
  0x4e   : > { %s198_s25 = sshll.u32 %s190_s7, 4  ;;  %p562_p2 = scmp.ne.s32.totalorder %s847_s5, %s561_s9  ;;  %s199_s25 = int_to_ptr.vmem [resolvable:$true] %s198_s25 }
  0x4f   : > { %s566_s19 = scalar_lea.hbm %s975_s2, 256  ;;  %p567_p12 = scmp.lt.u32.totalorder %s847_s5, %s975_s2 }
  0x50   : > { %p564_p6 = pnand %p562_p2, %p533_p1  ;;  %p568_p13 = scmp.lt.u32.totalorder %s566_s19, %s561_s9 }
  0x51   : > { %p570_p3 = scmp.lt.u32.totalorder %s561_s9, %s847_s5 }
  0x52   : > { %p565_p7 = pneg %p564_p6  ;;  %p569_p8 = por %p568_p13, %p567_p12 }
  0x54   : > { %p571_p9 = por %p570_p3, %p569_p8 }
  0x56   : > { %p572_p4 = pnand %p571_p9, %p565_p7 }
  0x58   : > { %575 = shalt.err (!%p572_p4)
}
  0x59   : > { %s576_s30 = scalar_lea.vmem %s199_s25, 128  ;;  %s685_s8 = smov [#allocation7]  }
  0x5a   : > { %p577_p5 = scmp.ne.s32.totalorder %s199_s25, %s576_s30  ;;  %s581_s10 = sshll.u32 %s685_s8, 4  ;;  %s582_s10 = int_to_ptr.vmem [resolvable:$false] %s581_s10 }
  0x5b   : > { %s583_s6 = scalar_lea.vmem %s582_s10, 256  ;;  %p584_p6 = scmp.lt.s32.totalorder %s199_s25, %s582_s10 }
  0x5c   : > { %p579_p0 = pnand %p577_p5, %p533_p1  ;;  %p585_p10 = scmp.lt.s32.totalorder %s583_s6, %s576_s30 }
  0x5e   : > { %p580_p2 = pneg %p579_p0  ;;  %p586_p12 = por %p585_p10, %p584_p6 }
  0x60   : > { %p587_p13 = pnand %p586_p12, %p580_p2 }
  0x62   : > { %590 = shalt.err (!%p587_p13)
}
  0x63   : > { %455 = dma.hbm_to_vmem [thread:$0]  (!%p840_p11), %s847_s5, 128, %s199_s25, %s187_s29  }
  0x64   : > { %p997_p7 = scmp.ne.s32.totalorder %s989_s24, 0 }
  0x65   : > { %p998_p8 = scmp.ne.s32.totalorder (!%p997_p7), %s985_s20, 0 }
  0x66   : > { %207 = sbr.rel (%p997_p7) target bundleno = 212 (0xd4), region = 32 }
  0x6d   : > { %644 = dma.done.wait (%p998_p8), [#allocation5], 16  }
  0x6e   : > { %646 = vsyncadd (%p998_p8), [#allocation5], 4294967280  ;;  %s904_s1 = sand.u32 1, %s665_s13   ;;  %p999_p10 = scmp.ne.s32.totalorder %s986_s21, 0 }
  0x6f   : > { %s422_s4 = sshll.u32 %s904_s1, 3  ;;  %s214_s7 = scalar_lea.sflag [#allocation3], %s904_s1 }
  0x70   : > { %s217_s11 = scalar_lea.vmem [#allocation6], %s422_s4 }
  0x71   : > { %648 = dma.done.wait (%p999_p10), %s214_s7, 128  }
  0x72   : > { %650 = vsyncadd (%p999_p10), %s214_s7, 4294967168  ;;  %s223_s24 = scalar_lea.sflag [#allocation8], %s904_s1  ;;  %s226_s5 = scalar_lea.vmem [#allocation7], %s422_s4 }
  0x73   : > { %652 = dma.done.wait (%p999_p10), %s223_s24, 128  }
  0x74   : > { %654 = vsyncadd (%p999_p10), %s223_s24, 4294967168 }
  0x75   : > { %231 = sfence }
  0x76   : > { %s255_s20 = sld [smem:[#allocation2]]  ;;  %s425_s25 = sld [smem:[#allocation2 + $0x1]]  ;;  %v266_v2 = vld [vmem:[%s217_s11] sm:$0xff]  ;;  %v271_v3 = vld [vmem:[%s226_s5] sm:$0xff] }
  0x77   : > { %s686_s29 = smov 0.0   ;;  %s424_s0 = sshll.u32 %s904_s1, 4 }
  0x78   : > { %s254_s8 = scalar_lea.vmem [#allocation9], %s424_s0  ;;  %s432_s6 = sshll.u32 %s673_s15, 8 }
  0x79   : > { %s291_s21 = sshll.u32 %s254_s8, 4  ;;  %s277_s11 = scalar_lea.sflag [#allocation4], %s904_s1  ;;  %s919_s21 = int_to_ptr.vmem [resolvable:$true] %s291_s21 }
  0x7a   : > { %s591_s15 = scalar_lea.vmem %s919_s21, 256  ;;  %p1000_p1 = scmp.ne.s32.totalorder %s987_s22, 0 }
  0x7b   : > { %p592_p11 = scmp.ne.s32.totalorder %s919_s21, %s591_s15  ;;  %s687_s5 = smov [#allocation9]  }
  0x7c   : > { %s256_s9 = smax.f32 %s686_s29, %s255_s20  ;;  %s258_s27 = smax.f32 %s686_s29, %s425_s25 }
  0x7d   : > { %s260_s18 = sadd.f32 %s258_s27, %s256_s9  ;;  %s924_s20 = scalar_lea.hbm %s976_s3, %s432_s6 }
  0x7e   : > { %p593_p3 = pnand %p592_p11, %p1000_p1  ;;  %s595_s25 = sshll.u32 %s687_s5, 4  ;;  %s596_s25 = int_to_ptr.vmem [resolvable:$false] %s595_s25 }
  0x7f   : > { %s261_s19 = sadd.f32 0.0001, %s260_s18  ;;  %s597_s29 = scalar_lea.vmem %s596_s25, 512 }
  0x80   : > { %p594_p9 = pneg %p593_p3  ;;  %p598_p4 = scmp.lt.s32.totalorder %s919_s21, %s596_s25 }
  0x81   : > { %v262_v0 = vstv %s261_s19  ;;  %p599_p5 = scmp.lt.s32.totalorder %s597_s29, %s591_s15 }
  0x82   : > { %516 = vrcp.f32 %v262_v0 }
  0x83   : > { %p600_p0 = por %p599_p5, %p598_p4 }
  0x85   : > { %p601_p2 = pnand %p600_p0, %p594_p9 }
  0x8c   : > { %v517_v1 = vpop.eup %516 }
  0x8d   : > { %433 = vpush %v517_v1 }
  0xbe   : > { %s434_s30 = spop %433 }
  0xbf   : > { %s265_s10 = smul.f32 %s434_s30, %s256_s9 }
  0xc0   : > { %s270_s4 = smul.f32 %s434_s30, %s258_s27 }
  0xc1   : > { %v267_v4 = vstv %s265_s10 }
  0xc2   : > { %v268_v5 = vmul.f32 %v267_v4, %v266_v2  ;;  %v272_v6 = vstv %s270_s4 }
  0xc3   : > { %v273_v7 = vmul.f32 %v272_v6, %v271_v3 }
  0xc4   : > { %269 = vst [vmem:[%s254_s8] sm:$0xff] %v268_v5 }
  0xc5   : > { %426 = vst [vmem:[%s254_s8 + $0x8] sm:$0xff] %v273_v7 }
  0xc6   : > { %604 = shalt.err (!%p601_p2)
}
  0xc7   : > { %s605_s9 = scalar_lea.hbm %s924_s20, 256  ;;  %s609_s19 = scalar_lea.hbm %s976_s3, 512 }
  0xc8   : > { %p606_p6 = scmp.ne.s32.totalorder %s924_s20, %s605_s9  ;;  %p610_p7 = scmp.lt.u32.totalorder %s924_s20, %s976_s3 }
  0xc9   : > { %p611_p8 = scmp.lt.u32.totalorder %s609_s19, %s605_s9  ;;  %p613_p11 = scmp.lt.u32.totalorder %s605_s9, %s924_s20 }
  0xca   : > { %p607_p12 = pnand %p606_p6, %p1000_p1 }
  0xcb   : > { %p612_p10 = por %p611_p8, %p610_p7 }
  0xcc   : > { %p608_p13 = pneg %p607_p12 }
  0xcd   : > { %p614_p3 = por %p613_p11, %p612_p10 }
  0xcf   : > { %p615_p9 = pnand %p614_p3, %p608_p13 }
  0xd1   : > { %618 = shalt.err (!%p615_p9)
}
  0xd2   : > { %s688_s8 = smov 128   ;;  %s689_s10 = smov 8  }
  0xd3   : > { %443 = dma.vmem_to_hbm [thread:$0]  (%p1000_p1), %s919_s21, 256, %s924_s20, %s277_s11, %s688_s8, %s688_s8, %s689_s10  }
  0xd4 PF: > { %s306_s6 = sand.u32 1, %s661_s12   ;;  %p1001_p4 = scmp.ne.s32.totalorder %s988_s23, 0 }
  0xd5   : > { %p1002_p5 = scmp.ge.s32.totalorder %s681_s17, 2  ;;  %s307_s4 = scalar_lea.sflag [#allocation4], %s306_s6 }
  0xd7   : > { %p457_p0 = pnand %p1002_p5, %p1001_p4 }
  0xd9   : > { %656 = dma.done.wait (!%p457_p0), %s307_s4, 256  }
  0xda   : > { %658 = vsyncadd (!%p457_p0), %s307_s4, 4294967040  ;;  %s23_s17 = sadd.s32 1, %s681_s17   ;;  %s1003_s12 = smov %s665_s13 }
  0xdb   : > { %p20_p2 = scmp.ge.s32.totalorder %s23_s17, 4   ;;  %s1004_s13 = smov %s669_s14 }
  0xdc   : > { %s1005_s14 = smov %s832_s28  ;;  %s1006_s15 = smov %s677_s16 }
  0xdd   : > { %s1007_s16 = smov %s1009_s26  ;;  %22 = sbr.rel (!%p20_p2) target bundleno = 12 (0xc), region = 96 }
  0xe4   :  { %312 = vsyncpa [#allocation3], 1 }
  0xe5   :  { %314 = vsyncpa [#allocation3 + $0x1], 1 }
  0xe6   :  { %315 = vsyncpa [#allocation8], 1 }
  0xe7   :  { %317 = vsyncpa [#allocation8 + $0x1], 1 }
  0xe8   :  { %318 = vsyncpa [#allocation4], 1 }
  0xe9   :  { %320 = vsyncpa [#allocation4 + $0x1], 1 }
  0xea   :  { %321 = vsyncpa [#allocation5], 1 }
  0xeb   :  { %323 = vsyncpa [#allocation5 + $0x1], 1 }

</bundles_post_ra>
